<compile_context>
chip_gen: v6e
topology: v6e:2x2x1
jax: 0.10.0
libtpu: 0.0.40
codegen_flags: <defaults>
</compile_context>

<pallas_src>
import functools

import jax
import jax.numpy as jnp
from jax.experimental import pallas as pl
from jax.experimental.pallas import tpu as pltpu


# ----------------------------------------------------------------------------
# In-kernel helpers
# ----------------------------------------------------------------------------
def _ln(t, g, b, eps=1e-5):
    """LayerNorm over the last dim (f32 math), matching torch.nn.LayerNorm."""
    mu = jnp.mean(t, axis=-1, keepdims=True)
    var = jnp.mean(jnp.square(t - mu), axis=-1, keepdims=True)
    return (t - mu) * jax.lax.rsqrt(var + eps) * g + b


# ----------------------------------------------------------------------------
# Kernel 1: patch embed + class token + positional embedding + ln_pre
# ----------------------------------------------------------------------------
def _embed_kernel(patches_ref, wp_ref, cls_ref, pos_ref, g_ref, b_ref,
                  o_ref, sc_ref):
    bt, num_patches, patch_k = patches_ref.shape
    lp, d = pos_ref.shape

    # conv1 as matmul on pre-extracted patches: bf16 operands, f32 accumulate.
    emb = jnp.dot(patches_ref[...].reshape(bt * num_patches, patch_k),
                  wp_ref[...], preferred_element_type=jnp.float32)

    # Assemble [cls ; patches ; zero pad] in a VMEM scratch (no concatenate);
    # pos-add + ln_pre over the whole padded block, then ONE dense aligned
    # store to the output block.
    if lp > num_patches + 1:
        sc_ref[...] = jnp.zeros_like(sc_ref)          # padded tail rows
    sc_ref[:, 0:1, :] = jnp.broadcast_to(
        cls_ref[...].reshape(1, 1, d), (bt, 1, d))
    sc_ref[:, 1:1 + num_patches, :] = emb.reshape(bt, num_patches, d)

    full = sc_ref[...] + pos_ref[...]                 # (bt, Lp, D) + (Lp, D)
    o_ref[...] = _ln(full, g_ref[...], b_ref[...]).astype(o_ref.dtype)


# ----------------------------------------------------------------------------
# Kernel 2: one ResidualAttentionBlock (LN1 -> MHA -> +res -> LN2 -> MLP -> +res)
# ----------------------------------------------------------------------------
def _resblock_kernel(num_heads, head_dim, true_len, mlp_chunk, compute_dtype,
                     x_ref, g1_ref, b1_ref, wqkv_ref, bqkv_ref, wo_ref, bo_ref,
                     g2_ref, b2_ref, wf_ref, bf_ref, wpj_ref, bpj_ref,
                     o_ref, attn_sc):
    bt, lp, d = x_ref.shape
    cd = compute_dtype
    x = x_ref[...]                                    # (bt, Lp, D) f32 residual

    # ---------------- attention branch ----------------
    xn = _ln(x, g1_ref[...], b1_ref[...])
    x2 = xn.reshape(bt * lp, d).astype(cd)            # Lp % 8 == 0 -> free reshape
    # fused QKV; q-scale (head_dim**-0.5) folded into wqkv/bqkv by the wrapper.
    qkv = jnp.dot(x2, wqkv_ref[...],
                  preferred_element_type=jnp.float32) + bqkv_ref[...]
    q3 = qkv[:, :d].reshape(bt, lp, d).astype(cd)
    k3 = qkv[:, d:2 * d].reshape(bt, lp, d).astype(cd)
    v3 = qkv[:, 2 * d:].reshape(bt, lp, d).astype(cd)

    if true_len < lp:
        # padded key positions get -inf bias so they carry no softmax mass
        key_mask = jax.lax.broadcasted_iota(jnp.int32, (1, 1, lp), 2) < true_len
        key_bias = jnp.where(key_mask, 0.0, -1e30).astype(jnp.float32)
    else:
        key_bias = None

    # Static loop over heads; each head's temporaries die at the scratch store,
    # so live ranges stay bounded (no carried f32 accumulator).
    for h in range(num_heads):
        lo = h * head_dim
        qh = q3[:, :, lo:lo + head_dim]               # (bt, Lp, hd)
        kh = k3[:, :, lo:lo + head_dim]
        vh = v3[:, :, lo:lo + head_dim]
        s = jnp.einsum("bld,bmd->blm", qh, kh,
                       preferred_element_type=jnp.float32)   # (bt, Lp, Lp)
        if key_bias is not None:
            s = s + key_bias
        s = s - jnp.max(s, axis=-1, keepdims=True)
        e = jnp.exp(s)
        p = e * pl.reciprocal(jnp.sum(e, axis=-1, keepdims=True), approx=True)
        oh = jnp.einsum("blm,bmd->bld", p.astype(cd), vh,
                        preferred_element_type=jnp.float32)  # (bt, Lp, hd)
        attn_sc[:, lo:lo + head_dim] = oh.reshape(bt * lp, head_dim).astype(cd)

    # ONE full-width (K = D) output projection instead of per-head K=hd matmuls.
    attn_out = jnp.dot(attn_sc[...], wo_ref[...],
                       preferred_element_type=jnp.float32) + bo_ref[...]
    x = x + attn_out.reshape(bt, lp, d)

    # ---------------- MLP branch (hidden dim chunked) ----------------
    yn = _ln(x, g2_ref[...], b2_ref[...])
    y2 = yn.reshape(bt * lp, d).astype(cd)
    d_hidden = wf_ref.shape[1]
    h2 = None
    for c0 in range(0, d_hidden, mlp_chunk):
        h1 = jnp.dot(y2, wf_ref[:, c0:c0 + mlp_chunk],
                     preferred_element_type=jnp.float32) + bf_ref[:, c0:c0 + mlp_chunk]
        # QuickGELU: x * sigmoid(1.702 x), exact sigmoid for accuracy.
        g = h1 * (1.0 / (1.0 + jnp.exp(-1.702 * h1)))
        part = jnp.dot(g.astype(cd), wpj_ref[c0:c0 + mlp_chunk, :],
                       preferred_element_type=jnp.float32)
        h2 = part if h2 is None else h2 + part
    x = x + (h2 + bpj_ref[...]).reshape(bt, lp, d)

    o_ref[...] = x.astype(o_ref.dtype)


# ----------------------------------------------------------------------------
# Wrapper plumbing
# ----------------------------------------------------------------------------
def _vmem_limit_bytes():
    """Per-generation scoped-VMEM request (v7x has only 64 MiB per TC)."""
    cap = 128 * 1024 * 1024
    try:
        info = pltpu.get_tpu_info()
        cap = int(getattr(info, "vmem_capacity_bytes", cap))
    except Exception:
        pass
    return int(min(max(cap - 16 * 1024 * 1024, 32 * 1024 * 1024),
                   100 * 1024 * 1024))


def _resident_spec(shape):
    """Constant-index, single-buffered (resident) BlockSpec for weights."""
    index_map = lambda b, _n=len(shape): (0,) * _n
    try:
        return pl.BlockSpec(shape, index_map, pipeline_mode=pl.Buffered(1))
    except (TypeError, AttributeError):   # older jax: fall back to default buffering
        return pl.BlockSpec(shape, index_map)


def _pick_mlp_chunk(d_hidden, max_chunk=1024):
    if d_hidden <= max_chunk:
        return d_hidden
    for c in range(max_chunk, 127, -128):
        if d_hidden % c == 0:
            return c
    return d_hidden


def _pick_batch_tile(n, *, seq_pad, d, mlp_chunk, weight_bytes, vmem_limit,
                     requested=None):
    if requested is not None:
        assert n % requested == 0
        return requested
    # rough per-image live f32 bytes inside the residual block kernel
    per_image = 4 * seq_pad * (12 * d + 2 * seq_pad + 2 * mlp_chunk)
    budget = max(vmem_limit - weight_bytes - (8 << 20), per_image)
    cap = max(1, min(8, budget // per_image))
    best = 1
    for t in range(1, n + 1):
        # prefer >=2 grid steps so both v7x TensorCores get work
        if n % t == 0 and t <= cap and (n // t >= 2 or t == n == 1):
            best = t
    return best


def _run_embed(patches, prep, *, batch_tile, vmem_limit):
    n, num_patches, patch_k = patches.shape
    d = prep["d"]
    lp = prep["seq_pad"]
    return pl.pallas_call(
        _embed_kernel,
        out_shape=jax.ShapeDtypeStruct((n, lp, d), jnp.float32),
        grid_spec=pltpu.PrefetchScalarGridSpec(
            num_scalar_prefetch=0,
            grid=(n // batch_tile,),
            in_specs=[
                pl.BlockSpec((batch_tile, num_patches, patch_k),
                             lambda b: (b, 0, 0)),
                _resident_spec((patch_k, d)),      # conv weight (K, D)
                _resident_spec((1, d)),            # class embedding
                _resident_spec((lp, d)),           # padded positional embedding
                _resident_spec((1, d)),            # ln_pre gamma
                _resident_spec((1, d)),            # ln_pre beta
            ],
            out_specs=pl.BlockSpec((batch_tile, lp, d), lambda b: (b, 0, 0)),
            scratch_shapes=[pltpu.VMEM((batch_tile, lp, d), jnp.float32)],
        ),
        compiler_params=pltpu.CompilerParams(
            dimension_semantics=("parallel",),
            vmem_limit_bytes=vmem_limit),
    )(patches, prep["conv_wt"], prep["cls"], prep["pos"],
      prep["ln_pre_g"], prep["ln_pre_b"])


def _run_block(x, blk, *, num_heads, head_dim, true_len, mlp_chunk,
               batch_tile, compute_dtype, vmem_limit):
    n, lp, d = x.shape
    d_hidden = blk["wf"].shape[1]
    kernel = functools.partial(_resblock_kernel, num_heads, head_dim,
                               true_len, mlp_chunk, compute_dtype)
    return pl.pallas_call(
        kernel,
        out_shape=jax.ShapeDtypeStruct((n, lp, d), jnp.float32),
        grid_spec=pltpu.PrefetchScalarGridSpec(
            num_scalar_prefetch=0,
            grid=(n // batch_tile,),
            in_specs=[
                pl.BlockSpec((batch_tile, lp, d), lambda b: (b, 0, 0)),
                _resident_spec((1, d)),            # ln1 gamma
                _resident_spec((1, d)),            # ln1 beta
                _resident_spec((d, 3 * d)),        # fused QKV weight (scaled)
                _resident_spec((1, 3 * d)),        # fused QKV bias (scaled)
                _resident_spec((d, d)),            # out_proj weight^T
                _resident_spec((1, d)),            # out_proj bias
                _resident_spec((1, d)),            # ln2 gamma
                _resident_spec((1, d)),            # ln2 beta
                _resident_spec((d, d_hidden)),     # c_fc^T
                _resident_spec((1, d_hidden)),     # c_fc bias
                _resident_spec((d_hidden, d)),     # c_proj^T
                _resident_spec((1, d)),            # c_proj bias
            ],
            out_specs=pl.BlockSpec((batch_tile, lp, d), lambda b: (b, 0, 0)),
            scratch_shapes=[pltpu.VMEM((batch_tile * lp, d), compute_dtype)],
        ),
        compiler_params=pltpu.CompilerParams(
            dimension_semantics=("parallel",),
            vmem_limit_bytes=vmem_limit),
    )(x, blk["g1"], blk["b1"], blk["wqkv"], blk["bqkv"], blk["wo"], blk["bo"],
      blk["g2"], blk["b2"], blk["wf"], blk["bf"], blk["wpj"], blk["bpj"])


# ----------------------------------------------------------------------------
# One-time weight preparation (hoisted out of the forward path)
# ----------------------------------------------------------------------------
def prepare_params(params, *, num_heads, compute_dtype=jnp.bfloat16):
    conv_w = params["conv_w"]
    d = conv_w.shape[0]
    assert d % num_heads == 0
    head_dim = d // num_heads
    scale = float(head_dim) ** -0.5
    seq_len = params["pos"].shape[0]
    seq_pad = ((seq_len + 7) // 8) * 8                 # token axis -> sublane multiple

    pos = params["pos"].astype(jnp.float32)
    pos_p = jnp.zeros((seq_pad, d), jnp.float32).at[:seq_len].set(pos)

    prep = {
        "d": d, "num_heads": num_heads, "head_dim": head_dim,
        "seq_len": seq_len, "seq_pad": seq_pad, "compute_dtype": compute_dtype,
        "conv_wt": conv_w.reshape(d, -1).T.astype(compute_dtype),   # (K, D)
        "cls": params["cls"].reshape(1, d).astype(jnp.float32),
        "pos": pos_p,
        "ln_pre_g": params["ln_pre_g"].reshape(1, d).astype(jnp.float32),
        "ln_pre_b": params["ln_pre_b"].reshape(1, d).astype(jnp.float32),
        "blocks": [],
    }
    for blk in params["blocks"]:
        wi, bi = blk["in_proj_w"], blk["in_proj_b"]
        wqkv = jnp.concatenate([wi[:d].T * scale, wi[d:2 * d].T, wi[2 * d:].T],
                               axis=1)                              # (D, 3D)
        bqkv = jnp.concatenate([bi[:d] * scale, bi[d:2 * d], bi[2 * d:]])
        prep["blocks"].append({
            "g1": blk["ln1_g"].reshape(1, d).astype(jnp.float32),
            "b1": blk["ln1_b"].reshape(1, d).astype(jnp.float32),
            "wqkv": wqkv.astype(compute_dtype),
            "bqkv": bqkv.reshape(1, 3 * d).astype(jnp.float32),
            "wo": blk["out_proj_w"].T.astype(compute_dtype),        # (D, D)
            "bo": blk["out_proj_b"].reshape(1, d).astype(jnp.float32),
            "g2": blk["ln2_g"].reshape(1, d).astype(jnp.float32),
            "b2": blk["ln2_b"].reshape(1, d).astype(jnp.float32),
            "wf": blk["fc_w"].T.astype(compute_dtype),              # (D, 4D)
            "bf": blk["fc_b"].reshape(1, -1).astype(jnp.float32),
            "wpj": blk["proj_w"].T.astype(compute_dtype),           # (4D, D)
            "bpj": blk["proj_b"].reshape(1, d).astype(jnp.float32),
        })
    return prep


# ----------------------------------------------------------------------------
# Forward (mirrors VisionTransformer.forward, visual_prompt=None path)
# ----------------------------------------------------------------------------
def vision_transformer_forward(x, prep, *, patch_size, feature_layers=None,
                               batch_tile=None):
    n, c_in, height, width_px = x.shape
    ps = patch_size
    d = prep["d"]
    cd = prep["compute_dtype"]
    hp, wp_ = height // ps, width_px // ps
    num_patches = hp * wp_
    seq_len = num_patches + 1
    lp = prep["seq_pad"]
    assert seq_len == prep["seq_len"], (
        "positional-embedding resize path not implemented")
    assert n >= 1 and n % 1 == 0
    # TODO(synk): bilinear interpolation of the positional embedding (input
    # resolution != pretraining grid), the visual_prompt prepend/strip path,
    # and the unused-by-this-forward ln_post / proj are not implemented.

    # Patch extraction (layout plumbing, ordering matches conv-weight flatten).
    patches = x.reshape(n, c_in, hp, ps, wp_, ps)
    patches = patches.transpose(0, 2, 4, 1, 3, 5).reshape(
        n, num_patches, c_in * ps * ps).astype(cd)

    d_hidden = prep["blocks"][0]["wf"].shape[1] if prep["blocks"] else 4 * d
    mlp_chunk = _pick_mlp_chunk(d_hidden)
    vmem_limit = _vmem_limit_bytes()
    itemsize = jnp.dtype(cd).itemsize
    weight_bytes = (3 * d * d + d * d + 2 * d * d_hidden) * itemsize
    batch_tile = _pick_batch_tile(
        n, seq_pad=lp, d=d, mlp_chunk=mlp_chunk, weight_bytes=weight_bytes,
        vmem_limit=vmem_limit, requested=batch_tile)

    xcur = _run_embed(patches, prep, batch_tile=batch_tile,
                      vmem_limit=vmem_limit)

    outs = []
    for i, blk in enumerate(prep["blocks"]):
        xcur = _run_block(xcur, blk, num_heads=prep["num_heads"],
                          head_dim=prep["head_dim"], true_len=seq_len,
                          mlp_chunk=mlp_chunk, batch_tile=batch_tile,
                          compute_dtype=cd, vmem_limit=vmem_limit)
        if feature_layers is not None and (i + 1) in feature_layers:
            outs.append(xcur[:, :seq_len, :])       # strip padded rows
    if feature_layers is None:
        return xcur[:, :seq_len, :]
    return outs


# ----------------------------------------------------------------------------
# Pure-JAX f32 reference mirroring the PyTorch module exactly
# ----------------------------------------------------------------------------
def vision_transformer_ref(x, params, *, num_heads, patch_size,
                           feature_layers=None):
    n, c_in, height, width_px = x.shape
    ps = patch_size
    d = params["conv_w"].shape[0]
    hp, wp_ = height // ps, width_px // ps
    num_patches = hp * wp_
    seq_len = num_patches + 1
    hd = d // num_heads

    patches = x.reshape(n, c_in, hp, ps, wp_, ps)
    patches = patches.transpose(0, 2, 4, 1, 3, 5).reshape(n, num_patches, -1)
    xe = patches @ params["conv_w"].reshape(d, -1).T
    cls = jnp.broadcast_to(params["cls"].reshape(1, 1, d), (n, 1, d))
    xe = jnp.concatenate([cls, xe], axis=1) + params["pos"][None]
    xe = _ln(xe, params["ln_pre_g"], params["ln_pre_b"])

    outs = []
    for i, blk in enumerate(params["blocks"]):
        xn = _ln(xe, blk["ln1_g"], blk["ln1_b"])
        wi, bi = blk["in_proj_w"], blk["in_proj_b"]
        q = xn @ wi[:d].T + bi[:d]
        k = xn @ wi[d:2 * d].T + bi[d:2 * d]
        v = xn @ wi[2 * d:].T + bi[2 * d:]
        q = q * (float(hd) ** -0.5)

        def split(t):
            return t.reshape(n, seq_len, num_heads, hd).transpose(0, 2, 1, 3)

        qh, kh, vh = split(q), split(k), split(v)
        s = jnp.einsum("nhld,nhmd->nhlm", qh, kh)
        pr = jax.nn.softmax(s, axis=-1)
        o = jnp.einsum("nhlm,nhmd->nhld", pr, vh)
        o = o.transpose(0, 2, 1, 3).reshape(n, seq_len, d)
        xe = xe + (o @ blk["out_proj_w"].T + blk["out_proj_b"])

        yn = _ln(xe, blk["ln2_g"], blk["ln2_b"])
        h1 = yn @ blk["fc_w"].T + blk["fc_b"]
        g = h1 * jax.nn.sigmoid(1.702 * h1)
        xe = xe + (g @ blk["proj_w"].T + blk["proj_b"])

        if feature_layers is not None and (i + 1) in feature_layers:
            outs.append(xe)
    return xe if feature_layers is None else outs


# ----------------------------------------------------------------------------
# Parameter init
# ----------------------------------------------------------------------------
def init_params(key, *, input_resolution, patch_size, width, layers):
    num_patches = (input_resolution // patch_size) ** 2
    d = width
    k_in = 3 * patch_size * patch_size
    keys = iter(jax.random.split(key, 5 + layers * 12))

    def nrm(shape, std):
        return jax.random.normal(next(keys), shape, jnp.float32) * std

    params = {
        "conv_w": nrm((d, 3, patch_size, patch_size), k_in ** -0.5),
        "cls": nrm((d,), d ** -0.5),
        "pos": nrm((num_patches + 1, d), d ** -0.5),
        "ln_pre_g": 1.0 + nrm((d,), 0.05),
        "ln_pre_b": nrm((d,), 0.05),
        "blocks": [],
    }
    for _ in range(layers):
        params["blocks"].append({
            "ln1_g": 1.0 + nrm((d,), 0.05),
            "ln1_b": nrm((d,), 0.05),
            "in_proj_w": nrm((3 * d, d), d ** -0.5),
            "in_proj_b": nrm((3 * d,), 0.02),
            "out_proj_w": nrm((d, d), d ** -0.5),
            "out_proj_b": nrm((d,), 0.02),
            "ln2_g": 1.0 + nrm((d,), 0.05),
            "ln2_b": nrm((d,), 0.05),
            "fc_w": nrm((4 * d, d), d ** -0.5),
            "fc_b": nrm((4 * d,), 0.02),
            "proj_w": nrm((d, 4 * d), (4 * d) ** -0.5),
            "proj_b": nrm((d,), 0.02),
        })
    return params


if __name__ == "__main__":
    # small shapes consistent with the module:
    # batch=4, 3-channel 16x16 images, patch 4 -> 4x4 grid (L=17, padded to 24),
    # width=32, 4 heads, 2 layers; features collected after layers 1 and 2.
    batch, resolution, patch, width, heads, layers = 4, 16, 4, 32, 4, 2
    feature_layers = (1, 2)

    key = jax.random.PRNGKey(0)
    k_params, k_x = jax.random.split(key)
    params = init_params(k_params, input_resolution=resolution,
                         patch_size=patch, width=width, layers=layers)
    x = jax.random.normal(k_x, (batch, 3, resolution, resolution), jnp.float32)

    prep = prepare_params(params, num_heads=heads, compute_dtype=jnp.bfloat16)
    outs = vision_transformer_forward(
        x, prep, patch_size=patch, feature_layers=feature_layers)
    outs = jax.block_until_ready(outs)

    refs = vision_transformer_ref(
        x, params, num_heads=heads, patch_size=patch,
        feature_layers=feature_layers)

    seq_len = (resolution // patch) ** 2 + 1
    assert len(outs) == len(refs) == len(feature_layers)
    for o, r in zip(outs, refs):
        assert o.shape == r.shape == (batch, seq_len, width)
        max_err = float(jnp.max(jnp.abs(o - r)))
        # bf16 matmul operands with f32 accumulation vs f32 reference.
        assert jnp.allclose(o, r, atol=5e-2, rtol=5e-2), (
            f"max abs err = {max_err}")

    print("KERNEL_OK")
</pallas_src>

<mosaic_0001>
module attributes {stable_mosaic.version = 11 : i64} {
  func.func @_embed_kernel(%arg0: i32, %arg1: memref<2x16x48xbf16, #tpu.memory_space<vmem>>, %arg2: memref<48x32xbf16, #tpu.memory_space<vmem>>, %arg3: memref<1x32xf32, #tpu.memory_space<vmem>>, %arg4: memref<24x32xf32, #tpu.memory_space<vmem>>, %arg5: memref<1x32xf32, #tpu.memory_space<vmem>>, %arg6: memref<1x32xf32, #tpu.memory_space<vmem>>, %arg7: memref<2x24x32xf32, #tpu.memory_space<vmem>>, %arg8: memref<2x24x32xf32, #tpu.memory_space<vmem>>) attributes {dimension_semantics = [#tpu.dimension_semantics<parallel>], iteration_bounds = array<i64: 2>, scalar_prefetch = 0 : i64, scratch_operands = 1 : i64, tpu.core_type = #tpu.core_type<tc>, window_params = [{transform_indices = @transform_0, window_bounds = array<i64: 2, 16, 48>}, {pipeline_mode = #tpu.pipeline_mode<synchronous>, transform_indices = @transform_1, window_bounds = array<i64: 48, 32>}, {pipeline_mode = #tpu.pipeline_mode<synchronous>, transform_indices = @transform_2, window_bounds = array<i64: 1, 32>}, {pipeline_mode = #tpu.pipeline_mode<synchronous>, transform_indices = @transform_3, window_bounds = array<i64: 24, 32>}, {pipeline_mode = #tpu.pipeline_mode<synchronous>, transform_indices = @transform_4, window_bounds = array<i64: 1, 32>}, {pipeline_mode = #tpu.pipeline_mode<synchronous>, transform_indices = @transform_5, window_bounds = array<i64: 1, 32>}, {transform_indices = @transform_6, window_bounds = array<i64: 2, 24, 32>}]} {
    %c0 = arith.constant 0 : index
    %c0_0 = arith.constant 0 : index
    %c0_1 = arith.constant 0 : index
    %0 = vector.load %arg1[%c0, %c0_0, %c0_1] : memref<2x16x48xbf16, #tpu.memory_space<vmem>>, vector<2x16x48xbf16>
    %1 = vector.shape_cast %0 : vector<2x16x48xbf16> to vector<32x48xbf16>
    %c0_2 = arith.constant 0 : index
    %c0_3 = arith.constant 0 : index
    %2 = vector.load %arg2[%c0_2, %c0_3] : memref<48x32xbf16, #tpu.memory_space<vmem>>, vector<48x32xbf16>
    %cst = arith.constant dense<0.000000e+00> : vector<32x32xf32>
    %3 = tpu.matmul %1, %2, %cst {dimension_numbers = #tpu.dot_dimension_numbers<[1], [0], [0], [1], [0, 0, 1, 1], [], []>} : vector<32x48xbf16>, vector<48x32xbf16>, vector<32x32xf32> -> vector<32x32xf32>
    %cst_4 = arith.constant 0.000000e+00 : f32
    %4 = vector.broadcast %cst_4 : f32 to vector<2x24x32xf32>
    %c0_5 = arith.constant 0 : index
    %c0_6 = arith.constant 0 : index
    %c0_7 = arith.constant 0 : index
    %5 = vector.load %arg8[%c0_5, %c0_6, %c0_7] : memref<2x24x32xf32, #tpu.memory_space<vmem>>, vector<2x24x32xf32>
    tpu.vector_store %arg8[%c0_5, %c0_6, %c0_7], %4 {strides = array<i32>} : memref<2x24x32xf32, #tpu.memory_space<vmem>>, vector<2x24x32xf32>,
    %c0_8 = arith.constant 0 : index
    %c0_9 = arith.constant 0 : index
    %6 = vector.load %arg3[%c0_8, %c0_9] : memref<1x32xf32, #tpu.memory_space<vmem>>, vector<1x32xf32>
    %7 = vector.shape_cast %6 : vector<1x32xf32> to vector<1x1x32xf32>
    %8 = vector.shape_cast %7 : vector<1x1x32xf32> to vector<1x1x32xf32>
    %9 = vector.broadcast %8 : vector<1x1x32xf32> to vector<2x1x32xf32>
    %c0_10 = arith.constant 0 : index
    %c0_11 = arith.constant 0 : index
    %c0_12 = arith.constant 0 : index
    %10 = vector.load %arg8[%c0_10, %c0_11, %c0_12] : memref<2x24x32xf32, #tpu.memory_space<vmem>>, vector<2x1x32xf32>
    tpu.vector_store %arg8[%c0_10, %c0_11, %c0_12], %9 {strides = array<i32>} : memref<2x24x32xf32, #tpu.memory_space<vmem>>, vector<2x1x32xf32>,
    %11 = vector.shape_cast %3 : vector<32x32xf32> to vector<2x16x32xf32>
    %c0_13 = arith.constant 0 : index
    %c1 = arith.constant 1 : index
    %c0_14 = arith.constant 0 : index
    %12 = vector.load %arg8[%c0_13, %c1, %c0_14] : memref<2x24x32xf32, #tpu.memory_space<vmem>>, vector<2x16x32xf32>
    tpu.vector_store %arg8[%c0_13, %c1, %c0_14], %11 {strides = array<i32>} : memref<2x24x32xf32, #tpu.memory_space<vmem>>, vector<2x16x32xf32>,
    %c0_15 = arith.constant 0 : index
    %c0_16 = arith.constant 0 : index
    %c0_17 = arith.constant 0 : index
    %13 = vector.load %arg8[%c0_15, %c0_16, %c0_17] : memref<2x24x32xf32, #tpu.memory_space<vmem>>, vector<2x24x32xf32>
    %c0_18 = arith.constant 0 : index
    %c0_19 = arith.constant 0 : index
    %14 = vector.load %arg4[%c0_18, %c0_19] : memref<24x32xf32, #tpu.memory_space<vmem>>, vector<24x32xf32>
    %15 = vector.shape_cast %14 : vector<24x32xf32> to vector<1x24x32xf32>
    %16 = vector.broadcast %15 : vector<1x24x32xf32> to vector<2x24x32xf32>
    %17 = arith.addf %13, %16 : vector<2x24x32xf32>
    %c0_20 = arith.constant 0 : index
    %c0_21 = arith.constant 0 : index
    %18 = vector.load %arg5[%c0_20, %c0_21] : memref<1x32xf32, #tpu.memory_space<vmem>>, vector<1x32xf32>
    %c0_22 = arith.constant 0 : index
    %c0_23 = arith.constant 0 : index
    %19 = vector.load %arg6[%c0_22, %c0_23] : memref<1x32xf32, #tpu.memory_space<vmem>>, vector<1x32xf32>
    %cst_24 = arith.constant dense<0.000000e+00> : vector<2x24xf32>
    %20 = vector.multi_reduction <add>, %17, %cst_24 [2] : vector<2x24x32xf32> to vector<2x24xf32>
    %21 = vector.shape_cast %20 : vector<2x24xf32> to vector<2x24x1xf32>
    %cst_25 = arith.constant 3.200000e+01 : f32
    %22 = vector.broadcast %cst_25 : f32 to vector<2x24x1xf32>
    %23 = arith.divf %21, %22 : vector<2x24x1xf32>
    %24 = vector.broadcast %23 : vector<2x24x1xf32> to vector<2x24x32xf32>
    %25 = arith.subf %17, %24 : vector<2x24x32xf32>
    %26 = arith.mulf %25, %25 : vector<2x24x32xf32>
    %cst_26 = arith.constant dense<0.000000e+00> : vector<2x24xf32>
    %27 = vector.multi_reduction <add>, %26, %cst_26 [2] : vector<2x24x32xf32> to vector<2x24xf32>
    %28 = vector.shape_cast %27 : vector<2x24xf32> to vector<2x24x1xf32>
    %cst_27 = arith.constant 3.200000e+01 : f32
    %29 = vector.broadcast %cst_27 : f32 to vector<2x24x1xf32>
    %30 = arith.divf %28, %29 : vector<2x24x1xf32>
    %31 = vector.broadcast %23 : vector<2x24x1xf32> to vector<2x24x32xf32>
    %32 = arith.subf %17, %31 : vector<2x24x32xf32>
    %cst_28 = arith.constant 9.99999974E-6 : f32
    %33 = vector.broadcast %cst_28 : f32 to vector<2x24x1xf32>
    %34 = arith.addf %30, %33 : vector<2x24x1xf32>
    %35 = math.rsqrt %34 : vector<2x24x1xf32>
    %36 = vector.broadcast %35 : vector<2x24x1xf32> to vector<2x24x32xf32>
    %37 = arith.mulf %32, %36 : vector<2x24x32xf32>
    %38 = vector.shape_cast %18 : vector<1x32xf32> to vector<1x1x32xf32>
    %39 = vector.broadcast %38 : vector<1x1x32xf32> to vector<2x24x32xf32>
    %40 = arith.mulf %37, %39 : vector<2x24x32xf32>
    %41 = vector.shape_cast %19 : vector<1x32xf32> to vector<1x1x32xf32>
    %42 = vector.broadcast %41 : vector<1x1x32xf32> to vector<2x24x32xf32>
    %43 = arith.addf %40, %42 : vector<2x24x32xf32>
    %c0_29 = arith.constant 0 : index
    %c0_30 = arith.constant 0 : index
    %c0_31 = arith.constant 0 : index
    %44 = vector.load %arg7[%c0_29, %c0_30, %c0_31] : memref<2x24x32xf32, #tpu.memory_space<vmem>>, vector<2x24x32xf32>
    tpu.vector_store %arg7[%c0_29, %c0_30, %c0_31], %43 {strides = array<i32>} : memref<2x24x32xf32, #tpu.memory_space<vmem>>, vector<2x24x32xf32>,
    return
  }
  func.func @transform_0(%arg0: i32) -> (i32, i32, i32) {
    %c0_i32 = arith.constant 0 : i32
    %c0_i32_0 = arith.constant 0 : i32
    %c0_i32_1 = arith.constant 0 : i32
    return %arg0, %c0_i32, %c0_i32_0 : i32, i32, i32
  }
  func.func @transform_1(%arg0: i32) -> (i32, i32) {
    %c0_i32 = arith.constant 0 : i32
    %c0_i32_0 = arith.constant 0 : i32
    %c0_i32_1 = arith.constant 0 : i32
    return %c0_i32, %c0_i32_0 : i32, i32
  }
  func.func @transform_2(%arg0: i32) -> (i32, i32) {
    %c0_i32 = arith.constant 0 : i32
    %c0_i32_0 = arith.constant 0 : i32
    %c0_i32_1 = arith.constant 0 : i32
    return %c0_i32, %c0_i32_0 : i32, i32
  }
  func.func @transform_3(%arg0: i32) -> (i32, i32) {
    %c0_i32 = arith.constant 0 : i32
    %c0_i32_0 = arith.constant 0 : i32
    %c0_i32_1 = arith.constant 0 : i32
    return %c0_i32, %c0_i32_0 : i32, i32
  }
  func.func @transform_4(%arg0: i32) -> (i32, i32) {
    %c0_i32 = arith.constant 0 : i32
    %c0_i32_0 = arith.constant 0 : i32
    %c0_i32_1 = arith.constant 0 : i32
    return %c0_i32, %c0_i32_0 : i32, i32
  }
  func.func @transform_5(%arg0: i32) -> (i32, i32) {
    %c0_i32 = arith.constant 0 : i32
    %c0_i32_0 = arith.constant 0 : i32
    %c0_i32_1 = arith.constant 0 : i32
    return %c0_i32, %c0_i32_0 : i32, i32
  }
  func.func @transform_6(%arg0: i32) -> (i32, i32, i32) {
    %c0_i32 = arith.constant 0 : i32
    %c0_i32_0 = arith.constant 0 : i32
    %c0_i32_1 = arith.constant 0 : i32
    return %arg0, %c0_i32, %c0_i32_0 : i32, i32, i32
  }
}

</mosaic_0001>

<bundles_post_ra>
// kernel: tpu_custom_call.1
= control target key start
LH: loop header
LB: loop body
LE: loop exit
PB: predicated region body
PF: predicated region fallthrough
CT: control target
= control target key end

     0   :  { %11 = vsyncpa [#allocation4], 0  ;;  %s1022_s0 = inlined_call_operand.vmem [shape: bf16[4,16,48], index: 0, kind: input, shape index: {}]   ;;  %s1023_s1 = inlined_call_operand.vmem [shape: bf16[48,32], index: 1, kind: input, shape index: {}]   ;;  %s1024_s2 = inlined_call_operand.vmem [shape: f32[1,32], index: 2, kind: input, shape index: {}]   ;;  %s1025_s3 = inlined_call_operand.hbm [shape: f32[24,32], index: 3, kind: input, shape index: {}]   ;;  %s1026_s4 = inlined_call_operand.vmem [shape: f32[1,32], index: 4, kind: input, shape index: {}]   ;;  %s1027_s5 = inlined_call_operand.vmem [shape: f32[1,32], index: 5, kind: input, shape index: {}]   ;;  %s1028_s6 = inlined_call_operand.hbm [shape: f32[4,24,32], index: 6, kind: output, shape index: {}]  }
   0x1   :  { %12 = vsyncpa [#allocation5], 0 }
   0x2   :  { %14 = vsyncpa [#allocation5 + $0x1], 0  ;;  %s843_s21 = smov 0   ;;  %s845_s22 = smov 0  }
   0x3   :  { %s847_s23 = smov 0   ;;  %s849_s24 = smov 0  }
   0x4 LB: > { %s864_s25 = sadd.s32 4294967295, %s799_s24   ;;  %s596_s26 = sadd.s32 4294967294, %s799_s24   ;;  %s799_s24 = sphi %s849_s24, %s1036_s24   ;;  %s795_s23 = sphi %s847_s23, %s1035_s23   ;;  %s791_s22 = sphi %s845_s22, %s1034_s22   ;;  %s787_s21 = sphi %s843_s21, %s1033_s21  }
   0x5   : > { %s868_s27 = sadd.s32 1, %s799_s24   ;;  %s158_s28 = sadd.s32 1, %s795_s23 }
   0x6   : > { %s155_s29 = ssub.s32 %s799_s24, %s868_s27  ;;  %p168_p0 = scmp.ne.s32.totalorder %s795_s23, %s791_s22 }
   0x7   : > { %p156_p1 = scmp.eq.s32.totalorder %s155_s29, 0  ;;  %p169_p2 = scmp.eq.s32.totalorder %s864_s25, 1 }
   0x8   : > { %p174_p3 = scmp.ne.s32.totalorder %s791_s22, %s787_s21  ;;  %p175_p4 = scmp.eq.s32.totalorder %s596_s26, 1 }
   0x9   : > { %s879_s30 = scalar_select %p156_p1, %s795_s23, %s158_s28  }
   0xa   : > { %p881_p5 = por %p169_p2, %p168_p0  ;;  %p885_p6 = por %p175_p4, %p174_p3 }
   0xb   : > { %p597_p7 = scmp.ge.s32.totalorder %s799_s24, 1  ;;  %p182_p8 = scmp.lt.s32.totalorder %s799_s24, 3 }
   0xc   : > { %s1030_s8 = scalar_select %p885_p6, 1, 0 }
   0xd   : > { %p651_p9 = scmp.eq.s32.totalorder %s864_s25, 0  ;;  %p892_p10 = pnand %p597_p7, %p182_p8 }
   0xe   : > { %s801_s10 = smov [#allocation3]  }
   0xf   : > { %s200_s11 = sshll.u32 %s801_s10, 4  ;;  %p643_p11 = pneg %p892_p10  ;;  %s201_s11 = int_to_ptr.vmem [resolvable:$true] %s200_s11 }
  0x10   : > { %s720_s12 = scalar_lea.vmem %s201_s11, 384  ;;  %p728_p3 = scmp.lt.s32.totalorder %s201_s11, %s201_s11 }
  0x11   : > { %p644_p12 = pnand %p651_p9, %p643_p11  ;;  %p721_p0 = scmp.ne.s32.totalorder %s201_s11, %s720_s12 }
  0x12   : > { %p729_p4 = scmp.lt.s32.totalorder %s720_s12, %s720_s12 }
  0x13   : > { %p711_p13 = pneg %p644_p12 }
  0x14   : > { %p730_p6 = por %p729_p4, %p728_p3 }
  0x15   : > { %p723_p1 = pnand %p721_p0, %p711_p13 }
  0x17   : > { %p724_p2 = pneg %p723_p1 }
  0x19   : > { %p731_p7 = pnand %p730_p6, %p724_p2 }
  0x1b   : > { %734 = shalt.err (!%p731_p7)
}
  0x1c   : > { %s802_s13 = smov 128   ;;  %s803_s14 = smov 8  }
  0x1d   : > { %646 = dma.hbm_to_vmem [thread:$0]  (!%p644_p12), %s1025_s3, 384, %s201_s11, [#allocation4], %s802_s13, %s802_s13, %s803_s14  }
  0x1e   : > { %232 = sbr.rel (%p892_p10) target bundleno = 585 (0x249), region = 44 }
  0x23   : > { %778 = dma.done.wait (%p651_p9), [#allocation4], 384  }
  0x24   : > { %780 = vsyncadd (%p651_p9), [#allocation4], 4294966912  ;;  %s602_s17 = sshll.u32 %s864_s25, 1  ;;  %v692_v0 = vld [vmem:[%s1023_s1 + $0x10] sm:$0xff]   ;;  %v693_v1 = vld [vmem:[%s1023_s1 + $0x8] sm:$0xff]   ;;  %vm310_vm0 = vcmask 392192  }
  0x25   : > { %p264_p8 = scmp.lt.s32.totalorder %s602_s17, 3  ;;  %625 = vmatprep.subr.bf16.mxu0 %v692_v0  ;;  %v694_v3 = vld [vmem:[%s1023_s1] sm:$0xff]   ;;  %vm366_vm1 = vcmask 261120   ;;  %v804_v5 = vmov 0.0   ;;  %vm374_vm2 = vcmask 253952   ;;  %v387_v11 = vld [vmem:[#allocation3] sm:$0xff] }
  0x26   : > { %626 = vmatpush3.bf16.msra.mxu0 %v692_v0  ;;  %370 = vst.msk [vmem:[#allocation2 + $0x18] sm:$0xff] %vm366_vm1, %v804_v5  ;;  %371 = vst.msk [vmem:[#allocation2 + $0x20] sm:$0xff] %vm366_vm1, %v804_v5  ;;  %v373_v6 = vld [vmem:[%s1024_s2] sm:$0x1]  ;;  %v388_v19 = vld [vmem:[#allocation3 + $0x8] sm:$0xff]  ;;  %s260_s15 = sand.u32 1, %s791_s22  }
  0x27   : > { %s1038_s17 = smov (!%p264_p8, %s602_s17), 3  ;;  %627 = vmatprep.subr.bf16.mxu0 %v693_v1  ;;  %367 = vst.msk [vmem:[#allocation2] sm:$0xff] %vm366_vm1, %v804_v5  ;;  %368 = vst.msk [vmem:[#allocation2 + $0x8] sm:$0xff] %vm366_vm1, %v804_v5  ;;  %v389_v18 = vld [vmem:[#allocation3 + $0x10] sm:$0xff]  ;;  %s635_s16 = smul.u32 48, %s260_s15 }
  0x28   : > { %s619_s18 = sshll.u32 %s1038_s17, 3  ;;  %369 = vst.msk [vmem:[#allocation2 + $0x10] sm:$0xff] %vm366_vm1, %v804_v5  ;;  %372 = vst.msk [vmem:[#allocation2 + $0x28] sm:$0xff] %vm366_vm1, %v804_v5  ;;  %s636_s28 = smul.u32 768, %s864_s25 }
  0x29   : > { %s268_s29 = scalar_lea.vmem %s1022_s0, %s619_s18  ;;  %376 = vst.msk [vmem:[#allocation2 + $0x18] sm:$0x1] %vm374_vm2, %v373_v6  ;;  %375 = vst.msk [vmem:[#allocation2] sm:$0x1] %vm374_vm2, %v373_v6  ;;  %s262_s26 = scalar_lea.vmem [#allocation6], %s635_s16 }
  0x2a   : > { %v695_v2 = vld [vmem:[%s268_s29] sm:$0xff]   ;;  %628 = vmatpush3.bf16.msra.mxu0 %v693_v1  ;;  %v696_v4 = vld [vmem:[%s268_s29 + $0x8] sm:$0xff]   ;;  %s522_s29 = sshll.u32 %s262_s26, 4  ;;  %s974_s11 = scalar_lea.hbm %s1028_s6, %s636_s28  ;;  %s976_s29 = int_to_ptr.vmem [resolvable:$true] %s522_s29 }
  0x2b   : > { %631 = vmatprep.mubr.msk.bf16.mxu0 %vm310_vm0, %v695_v2  ;;  %629 = vmatprep.subr.bf16.mxu0 %v694_v3  ;;  %s982_s25 = scalar_lea.sflag [#allocation5], %s260_s15  ;;  %s735_s12 = scalar_lea.vmem %s976_s29, 768 }
  0x2c   : > { %p736_p6 = scmp.ne.s32.totalorder %s976_s29, %s735_s12  ;;  %s805_s13 = smov [#allocation6]  }
  0x2d   : > { %s739_s14 = sshll.u32 %s805_s13, 4  ;;  %s740_s14 = int_to_ptr.vmem [resolvable:$false] %s739_s14 }
  0x2e   : > { %630 = vmatpush3.bf16.msra.mxu0 %v694_v3  ;;  %p737_p9 = pnand %p736_p6, %p881_p5  ;;  %s741_s16 = scalar_lea.vmem %s740_s14, 1536 }
  0x2f   : > { %p742_p11 = scmp.lt.s32.totalorder %s976_s29, %s740_s14  ;;  %p743_p12 = scmp.lt.s32.totalorder %s741_s16, %s735_s12 }
  0x30   : > { %p738_p10 = pneg %p737_p9 }
  0x31   : > { %632 = vmatmul.mubr.msk.bf16.vlgmr.msra.gmra.mxu0 %vm310_vm0, %v696_v4  ;;  %p744_p13 = por %p743_p12, %p742_p11 }
  0x33   : > { %p745_p0 = pnand %p744_p13, %p738_p10 }
  0xf1   : > { %v633_v7 = vpop.f32.mrf.mxu0 }
  0xf2   : > { %379 = vst.msk [vmem:[#allocation2 + $0x19] sm:$0xff] %vm366_vm1, %v633_v7 }
  0xf3   : > { %v351_v8 = vpop.f32.mrf.mxu0 }
  0xf4   : > { %377 = vst.msk [vmem:[#allocation2 + $0x1] sm:$0xff] %vm366_vm1, %v351_v8 }
  0xf5   : > { %v634_v9 = vpop.f32.mrf.mxu0 }
  0xf6   : > { %380 = vst.msk [vmem:[#allocation2 + $0x21] sm:$0xff] %vm366_vm1, %v634_v9 }
  0xf7   : > { %v354_v10 = vpop.f32.mrf.mxu0 }
  0xf8   : > { %378 = vst.msk [vmem:[#allocation2 + $0x9] sm:$0xff] %vm366_vm1, %v354_v10 }
  0xf9   : > { %v384_v12 = vld [vmem:[#allocation2 + $0x18] sm:$0xff] }
  0xfa   : > { %v393_v13 = vadd.f32 %v387_v11, %v384_v12 }
  0xfb   : > { %v381_v14 = vld [vmem:[#allocation2] sm:$0xff] }
  0xfc   : > { %v407_v15 = vsel %vm366_vm1, %v393_v13, 0.0  ;;  %v390_v16 = vadd.f32 %v387_v11, %v381_v14 }
  0xfd   : > { %408 = vadd.xlane.f32.xlu1 %v407_v15  ;;  %v386_v20 = vld [vmem:[#allocation2 + $0x28] sm:$0xff]  ;;  %v385_v23 = vld [vmem:[#allocation2 + $0x20] sm:$0xff] }
  0xfe   : > { %v398_v17 = vsel %vm366_vm1, %v390_v16, 0.0  ;;  %v395_v28 = vadd.f32 %v389_v18, %v386_v20  ;;  %v394_v29 = vadd.f32 %v388_v19, %v385_v23  ;;  %v613_v20 = vld [vmem:[%s1027_s5] ss:$0 sm:$0xff] }
  0xff   : > { %399 = vadd.xlane.f32.xlu0 %v398_v17  ;;  %v383_v21 = vld [vmem:[#allocation2 + $0x10] sm:$0xff]  ;;  %v382_v22 = vld [vmem:[#allocation2 + $0x8] sm:$0xff]  ;;  %v612_v17 = vld [vmem:[%s1026_s4] ss:$0 sm:$0xff] }
 0x100   : > { %v392_v24 = vadd.f32 %v389_v18, %v383_v21  ;;  %v391_v25 = vadd.f32 %v388_v19, %v382_v22  ;;  %v413_v30 = vsel %vm366_vm1, %v395_v28, 0.0  ;;  %v410_v31 = vsel %vm366_vm1, %v394_v29, 0.0 }
 0x102   : > { %v404_v26 = vsel %vm366_vm1, %v392_v24, 0.0  ;;  %v401_v27 = vsel %vm366_vm1, %v391_v25, 0.0 }
 0x103   : > { %405 = vadd.xlane.f32.xlu1 %v404_v26  ;;  %402 = vadd.xlane.f32.xlu0 %v401_v27 }
 0x107   : > { %414 = vadd.xlane.f32.xlu1 %v413_v30  ;;  %411 = vadd.xlane.f32.xlu0 %v410_v31 }
 0x186   : > { %v409_v32 = vpop.xlane.xlu1 %408 }
 0x187   : > { %v420_v33 = vmul.f32 0.03125, %v409_v32 }
 0x188   : > { %v400_v34 = vpop.xlane.xlu0 %399 }
 0x189   : > { %v426_v35 = vsub.f32 %v393_v13, %v420_v33  ;;  %v417_v36 = vmul.f32 0.03125, %v400_v34 }
 0x18b   : > { %v941_v37 = vsub.f32 %v390_v16, %v417_v36  ;;  %v432_v38 = vmul.f32 %v426_v35, %v426_v35 }
 0x18c   : > { %v406_v39 = vpop.xlane.xlu1 %405  ;;  %v403_v40 = vpop.xlane.xlu0 %402 }
 0x18d   : > { %v419_v41 = vmul.f32 0.03125, %v406_v39  ;;  %v418_v42 = vmul.f32 0.03125, %v403_v40  ;;  %v444_v43 = vsel %vm366_vm1, %v432_v38, 0.0  ;;  %v429_v44 = vmul.f32 %v941_v37, %v941_v37 }
 0x18e   : > { %445 = vadd.xlane.f32.xlu1 %v444_v43 }
 0x18f   : > { %v946_v45 = vsub.f32 %v392_v24, %v419_v41  ;;  %v424_v46 = vsub.f32 %v391_v25, %v418_v42  ;;  %v435_v47 = vsel %vm366_vm1, %v429_v44, 0.0 }
 0x190   : > { %v415_v48 = vpop.xlane.xlu1 %414  ;;  %436 = vadd.xlane.f32.xlu0 %v435_v47  ;;  %v412_v49 = vpop.xlane.xlu0 %411 }
 0x191   : > { %v422_v50 = vmul.f32 0.03125, %v415_v48  ;;  %v421_v51 = vmul.f32 0.03125, %v412_v49  ;;  %v431_v52 = vmul.f32 %v946_v45, %v946_v45  ;;  %v430_v53 = vmul.f32 %v424_v46, %v424_v46 }
 0x193   : > { %v428_v54 = vsub.f32 %v395_v28, %v422_v50  ;;  %v427_v55 = vsub.f32 %v394_v29, %v421_v51  ;;  %v441_v56 = vsel %vm366_vm1, %v431_v52, 0.0  ;;  %v438_v57 = vsel %vm366_vm1, %v430_v53, 0.0 }
 0x194   : > { %442 = vadd.xlane.f32.xlu0 %v441_v56  ;;  %439 = vadd.xlane.f32.xlu1 %v438_v57 }
 0x195   : > { %v434_v58 = vmul.f32 %v428_v54, %v428_v54  ;;  %v433_v59 = vmul.f32 %v427_v55, %v427_v55 }
 0x197   : > { %v450_v60 = vsel %vm366_vm1, %v434_v58, 0.0  ;;  %v447_v61 = vsel %vm366_vm1, %v433_v59, 0.0 }
 0x198   : > { %451 = vadd.xlane.f32.xlu1 %v450_v60  ;;  %448 = vadd.xlane.f32.xlu0 %v447_v61 }
 0x217   : > { %v446_v62 = vpop.xlane.xlu1 %445 }
 0x218   : > { %v456_v63 = vmul.f32 0.03125, %v446_v62 }
 0x219   : > { %v437_v0 = vpop.xlane.xlu0 %436 }
 0x21a   : > { %v462_v1 = vadd.f32 1e-05, %v456_v63  ;;  %v453_v2 = vmul.f32 0.03125, %v437_v0 }
 0x21c   : > { %697 = vrsqrt.f32 %v462_v1  ;;  %v459_v3 = vadd.f32 1e-05, %v453_v2 }
 0x21d   : > { %v440_v4 = vpop.xlane.xlu1 %439  ;;  %v443_v5 = vpop.xlane.xlu0 %442 }
 0x21e   : > { %699 = vrsqrt.f32 %v459_v3  ;;  %v454_v6 = vmul.f32 0.03125, %v440_v4  ;;  %v455_v7 = vmul.f32 0.03125, %v443_v5 }
 0x220   : > { %v460_v8 = vadd.f32 1e-05, %v454_v6  ;;  %v461_v9 = vadd.f32 1e-05, %v455_v7 }
 0x221   : > { %v452_v10 = vpop.xlane.xlu1 %451  ;;  %v449_v11 = vpop.xlane.xlu0 %448 }
 0x222   : > { %701 = vrsqrt.f32 %v460_v8  ;;  %v458_v12 = vmul.f32 0.03125, %v452_v10  ;;  %v457_v13 = vmul.f32 0.03125, %v449_v11 }
 0x223   : > { %703 = vrsqrt.f32 %v461_v9 }
 0x224   : > { %v464_v14 = vadd.f32 1e-05, %v458_v12  ;;  %v463_v15 = vadd.f32 1e-05, %v457_v13 }
 0x226   : > { %705 = vrsqrt.f32 %v464_v14 }
 0x227   : > { %707 = vrsqrt.f32 %v463_v15 }
 0x229   : > { %v698_v16 = vpop.eup %697 }
 0x22a   : > { %v474_v18 = vmul.f32 %v698_v16, %v426_v35 }
 0x22b   : > { %v700_v19 = vpop.eup %699 }
 0x22c   : > { %v486_v21 = vmul.f32 %v612_v17, %v474_v18  ;;  %v471_v22 = vmul.f32 %v700_v19, %v941_v37 }
 0x22e   : > { %v498_v23 = vadd.f32 %v613_v20, %v486_v21  ;;  %v483_v24 = vmul.f32 %v612_v17, %v471_v22 }
 0x22f   : > { %v702_v25 = vpop.eup %701 }
 0x230   : > { %v704_v26 = vpop.eup %703  ;;  %504 = vst.msk [vmem:[%s262_s26 + $0x18] sm:$0xff] %vm366_vm1, %v498_v23  ;;  %v495_v27 = vadd.f32 %v613_v20, %v483_v24  ;;  %v472_v28 = vmul.f32 %v702_v25, %v424_v46 }
 0x231   : > { %v473_v29 = vmul.f32 %v704_v26, %v946_v45 }
 0x232   : > { %501 = vst.msk [vmem:[%s262_s26] sm:$0xff] %vm366_vm1, %v495_v27  ;;  %v484_v30 = vmul.f32 %v612_v17, %v472_v28 }
 0x233   : > { %v706_v31 = vpop.eup %705  ;;  %v485_v32 = vmul.f32 %v612_v17, %v473_v29 }
 0x234   : > { %v708_v33 = vpop.eup %707  ;;  %v496_v34 = vadd.f32 %v613_v20, %v484_v30  ;;  %v476_v35 = vmul.f32 %v706_v31, %v428_v54 }
 0x235   : > { %v497_v36 = vadd.f32 %v613_v20, %v485_v32  ;;  %v475_v37 = vmul.f32 %v708_v33, %v427_v55 }
 0x236   : > { %502 = vst.msk [vmem:[%s262_s26 + $0x8] sm:$0xff] %vm366_vm1, %v496_v34  ;;  %v488_v38 = vmul.f32 %v612_v17, %v476_v35 }
 0x237   : > { %503 = vst.msk [vmem:[%s262_s26 + $0x10] sm:$0xff] %vm366_vm1, %v497_v36  ;;  %v487_v39 = vmul.f32 %v612_v17, %v475_v37 }
 0x238   : > { %v500_v40 = vadd.f32 %v613_v20, %v488_v38 }
 0x239   : > { %v499_v41 = vadd.f32 %v613_v20, %v487_v39 }
 0x23a   : > { %506 = vst.msk [vmem:[%s262_s26 + $0x28] sm:$0xff] %vm366_vm1, %v500_v40 }
 0x23b   : > { %505 = vst.msk [vmem:[%s262_s26 + $0x20] sm:$0xff] %vm366_vm1, %v499_v41 }
 0x23c   : > { %748 = shalt.err (!%p745_p0)
}
 0x23d   : > { %s749_s15 = scalar_lea.hbm %s974_s11, 768  ;;  %s753_s19 = scalar_lea.hbm %s1028_s6, 1536 }
 0x23e   : > { %p750_p1 = scmp.ne.s32.totalorder %s974_s11, %s749_s15  ;;  %p754_p4 = scmp.lt.s32.totalorder %s974_s11, %s1028_s6 }
 0x23f   : > { %p755_p7 = scmp.lt.s32.totalorder %s753_s19, %s749_s15 }
 0x240   : > { %p751_p2 = pnand %p750_p1, %p881_p5 }
 0x241   : > { %p756_p8 = por %p755_p7, %p754_p4 }
 0x242   : > { %p752_p3 = pneg %p751_p2 }
 0x244   : > { %p757_p6 = pnand %p756_p8, %p752_p3 }
 0x246   : > { %760 = shalt.err (!%p757_p6)
}
 0x247   : > { %s806_s28 = smov 128   ;;  %s807_s9 = smov 8  }
 0x248   : > { %641 = dma.vmem_to_hbm [thread:$0]  (%p881_p5), %s976_s29, 768, %s974_s11, %s982_s25, %s806_s28, %s806_s28, %s807_s9  }
 0x249 PF: > { %p653_p9 = scmp.ge.s32.totalorder %s799_s24, 2  ;;  %s537_s10 = sand.u32 1, %s787_s21  }
 0x24a   : > { %p1032_p10 = scmp.ne.s32.totalorder %s1030_s8, 0  ;;  %s538_s12 = scalar_lea.sflag [#allocation5], %s537_s10 }
 0x24c   : > { %p648_p11 = pnand %p653_p9, %p1032_p10 }
 0x24e   : > { %p649_p12 = pneg %p648_p11 }
 0x250   : > { %782 = dma.done.wait (%p649_p12), %s538_s12, 768  }
 0x251   : > { %784 = vsyncadd (%p649_p12), %s538_s12, 4294966528  ;;  %p17_p13 = scmp.ge.s32.totalorder %s868_s27, 4   ;;  %s1033_s21 = smov %s791_s22 }
 0x252   : > { %s1034_s22 = smov %s795_s23  ;;  %s1035_s23 = smov %s879_s30 }
 0x253   : > { %s1036_s24 = smov %s868_s27  ;;  %19 = sbr.rel (!%p17_p13) target bundleno = 4 (0x4), region = 84 }
 0x258   :  { %543 = vsyncpa [#allocation4], 1 }
 0x259   :  { %545 = vsyncpa [#allocation4 + $0x1], 1 }
 0x25a   :  { %546 = vsyncpa [#allocation5], 1 }
 0x25b   :  { %548 = vsyncpa [#allocation5 + $0x1], 1 }

</bundles_post_ra>
